<compile_context>
chip_gen: v7x
topology: tpu7x:2x2x1
jax: 0.10.0
libtpu: 0.0.40
codegen_flags: <defaults>
</compile_context>

<pallas_src>
import functools

import jax
import jax.numpy as jnp
from jax.experimental import pallas as pl
from jax.experimental.pallas import tpu as pltpu

LANE = 128  # TPU lane width; only the fused head OUTPUT dim is padded to this.


def actor_critic_kernel(x_ref,
                        w1_ref, b1_ref,
                        w2_ref, b2_ref,
                        w3_ref, b3_ref,
                        wh_ref, bh_ref,
                        out_ref):
    # Shared MLP. Dropout == identity (eval mode).
    # Matmuls run on the MXU in bf16 with f32 accumulation; bias-add / ReLU
    # (VPU work) stay in f32.
    x = x_ref[...].astype(jnp.bfloat16)                              # (bm, D) bf16
    h1 = jnp.maximum(
        jnp.dot(x, w1_ref[...], preferred_element_type=jnp.float32)
        + b1_ref[...], 0.0)                                          # (bm, 256) f32
    h2 = jnp.maximum(
        jnp.dot(h1.astype(jnp.bfloat16), w2_ref[...],
                preferred_element_type=jnp.float32) + b2_ref[...], 0.0)   # (bm, 128)
    h3 = jnp.maximum(
        jnp.dot(h2.astype(jnp.bfloat16), w3_ref[...],
                preferred_element_type=jnp.float32) + b3_ref[...], 0.0)   # (bm, 64)
    # Fused actor|critic head: single K=64 matmul, lane-dense (bm, 128) store.
    head = (jnp.dot(h3.astype(jnp.bfloat16), wh_ref[...],
                    preferred_element_type=jnp.float32) + bh_ref[...])
    out_ref[...] = head.astype(out_ref.dtype)                        # bf16 store


def pack_params(params):
    """One-time weight packing (call OUTSIDE the per-forward jit path).

    Weights -> bf16 (MXU path, half the weight DMA); biases stay f32 (VPU
    bias-add). Actor & critic are fused into one (64, 128) head:
      columns [0:A] = actor, column A = critic, rest zero.
    No contraction-dim padding anywhere (D=32 and 64 are legal MXU K dims).
    """
    A = params["wa"].shape[1]
    assert (A + 1) <= LANE

    wh = jnp.concatenate([params["wa"], params["wc"]], axis=1)              # (64, A+1)
    wh = jnp.pad(wh, ((0, 0), (0, LANE - (A + 1)))).astype(jnp.bfloat16)    # (64, 128)
    bh = jnp.concatenate([params["ba"], params["bc"]], axis=1)              # (1, A+1)
    bh = jnp.pad(bh, ((0, 0), (0, LANE - (A + 1)))).astype(jnp.float32)     # (1, 128)

    return {
        "w1": params["w1"].astype(jnp.bfloat16),   # (D, 256)
        "b1": params["b1"].astype(jnp.float32),    # (1, 256)
        "w2": params["w2"].astype(jnp.bfloat16),   # (256, 128)
        "b2": params["b2"].astype(jnp.float32),    # (1, 128)
        "w3": params["w3"].astype(jnp.bfloat16),   # (128, 64)
        "b3": params["b3"].astype(jnp.float32),    # (1, 64)
        "wh": wh,                                  # (64, 128)
        "bh": bh,                                  # (1, 128)
    }


def _choose_block_m(B):
    """Largest tile (multiple of 8, divides B, <= 2048 for VMEM headroom) that
    still leaves >= 2 grid steps so both v7x TensorCores get work."""
    for cand in (2048, 1024, 512, 256, 128, 64, 32, 16, 8):
        if B % cand == 0 and B // cand >= 2:
            return cand
    # Small / ragged batch: single full-array block (always a legal block shape).
    return B


def actor_critic_forward(x, packed, *, num_actions, block_m=None):
    """x: (B, D) float32. packed: output of pack_params().
    Returns (actor_logits (B, A) f32, value (B,) f32)."""
    B, D = x.shape
    A = num_actions
    bm = _choose_block_m(B) if block_m is None else block_m
    assert (B % bm == 0) and (bm == B or bm % 8 == 0)

    w1, b1 = packed["w1"], packed["b1"]
    w2, b2 = packed["w2"], packed["b2"]
    w3, b3 = packed["w3"], packed["b3"]
    wh, bh = packed["wh"], packed["bh"]

    def full(arr):
        # Grid-invariant whole-array block: weights/biases stay resident in VMEM.
        return pl.BlockSpec(arr.shape, lambda i: (0, 0))

    # Advisory cost estimate for XLA's scheduler.
    flops = 2 * B * (D * 256 + 256 * 128 + 128 * 64 + 64 * LANE)
    weight_bytes = sum(int(a.size * a.dtype.itemsize)
                       for a in (w1, b1, w2, b2, w3, b3, wh, bh))
    bytes_accessed = int(x.size * x.dtype.itemsize) + weight_bytes + B * LANE * 2
    cost = pl.CostEstimate(flops=flops, transcendentals=0,
                           bytes_accessed=bytes_accessed)

    head = pl.pallas_call(
        actor_critic_kernel,
        out_shape=jax.ShapeDtypeStruct((B, LANE), jnp.bfloat16),
        grid_spec=pltpu.PrefetchScalarGridSpec(
            num_scalar_prefetch=0,
            grid=(B // bm,),
            in_specs=[
                pl.BlockSpec((bm, D), lambda i: (i, 0)),   # raw f32 x tile
                full(w1), full(b1),
                full(w2), full(b2),
                full(w3), full(b3),
                full(wh), full(bh),
            ],
            out_specs=pl.BlockSpec((bm, LANE), lambda i: (i, 0)),
        ),
        compiler_params=pltpu.CompilerParams(
            dimension_semantics=("parallel",)),
        cost_estimate=cost,
    )(x, w1, b1, w2, b2, w3, b3, wh, bh)

    # Slices stay inside the same jit so XLA fuses them into one pass over head.
    actor_logits = head[:, :A].astype(jnp.float32)
    value = head[:, A].astype(jnp.float32)          # critic .squeeze(-1)
    return actor_logits, value


def init_params(key, input_dim, num_actions):
    """Deterministic synthetic parameters. Weights stored as (in, out)."""
    dims = [(input_dim, 256), (256, 128), (128, 64),
            (64, num_actions), (64, 1)]
    names = ["1", "2", "3", "a", "c"]
    params = {}
    for name, (fan_in, fan_out) in zip(names, dims):
        key, kw, kb = jax.random.split(key, 3)
        bound = 1.0 / jnp.sqrt(fan_in)
        params["w" + name] = jax.random.uniform(
            kw, (fan_in, fan_out), jnp.float32, -bound, bound)
        params["b" + name] = jax.random.uniform(
            kb, (1, fan_out), jnp.float32, -bound, bound)
    return params


def reference_forward(x, p):
    h = jnp.maximum(x @ p["w1"] + p["b1"], 0.0)
    h = jnp.maximum(h @ p["w2"] + p["b2"], 0.0)
    h = jnp.maximum(h @ p["w3"] + p["b3"], 0.0)
    return h @ p["wa"] + p["ba"], (h @ p["wc"] + p["bc"])[:, 0]


if __name__ == "__main__":
    INPUT_DIM = 32
    NUM_ACTIONS = 6
    BATCH = 256      # -> block_m=128, 2 grid steps (both v7x TensorCores busy)

    key = jax.random.PRNGKey(0)
    key, kx = jax.random.split(key)
    x = jax.random.normal(kx, (BATCH, INPUT_DIM), jnp.float32)
    params = init_params(key, INPUT_DIM, NUM_ACTIONS)

    # Pack/cast weights exactly once, outside the per-call jit path.
    packed = jax.device_put(pack_params(params))

    fwd = jax.jit(functools.partial(actor_critic_forward,
                                    num_actions=NUM_ACTIONS))
    actor_logits, value = fwd(x, packed)
    jax.block_until_ready((actor_logits, value))

    ref_actor, ref_value = reference_forward(x, params)
    assert actor_logits.shape == (BATCH, NUM_ACTIONS)
    assert value.shape == (BATCH,)
    # bf16 MXU inputs + bf16 output store with f32 accumulation -> relaxed
    # tolerance vs the f32 reference.
    # TODO(synk): keep the critic column in f32 if PPO baseline precision matters.
    assert jnp.allclose(actor_logits, ref_actor, atol=1e-1, rtol=5e-2)
    assert jnp.allclose(value, ref_value, atol=1e-1, rtol=5e-2)

    print("KERNEL_OK")
</pallas_src>

<mosaic_0001>
module attributes {stable_mosaic.version = 11 : i64} {
  func.func @actor_critic_kernel(%arg0: i32, %arg1: memref<128x32xf32, #tpu.memory_space<vmem>>, %arg2: memref<32x256xbf16, #tpu.memory_space<vmem>>, %arg3: memref<1x256xf32, #tpu.memory_space<vmem>>, %arg4: memref<256x128xbf16, #tpu.memory_space<vmem>>, %arg5: memref<1x128xf32, #tpu.memory_space<vmem>>, %arg6: memref<128x64xbf16, #tpu.memory_space<vmem>>, %arg7: memref<1x64xf32, #tpu.memory_space<vmem>>, %arg8: memref<64x128xbf16, #tpu.memory_space<vmem>>, %arg9: memref<1x128xf32, #tpu.memory_space<vmem>>, %arg10: memref<128x128xbf16, #tpu.memory_space<vmem>>) attributes {dimension_semantics = [#tpu.dimension_semantics<parallel>], iteration_bounds = array<i64: 2>, scalar_prefetch = 0 : i64, scratch_operands = 0 : i64, tpu.core_type = #tpu.core_type<tc>, window_params = [{transform_indices = @transform_0, window_bounds = array<i64: 128, 32>}, {pipeline_mode = #tpu.pipeline_mode<synchronous>, transform_indices = @transform_1, window_bounds = array<i64: 32, 256>}, {pipeline_mode = #tpu.pipeline_mode<synchronous>, transform_indices = @transform_2, window_bounds = array<i64: 1, 256>}, {pipeline_mode = #tpu.pipeline_mode<synchronous>, transform_indices = @transform_3, window_bounds = array<i64: 256, 128>}, {pipeline_mode = #tpu.pipeline_mode<synchronous>, transform_indices = @transform_4, window_bounds = array<i64: 1, 128>}, {pipeline_mode = #tpu.pipeline_mode<synchronous>, transform_indices = @transform_5, window_bounds = array<i64: 128, 64>}, {pipeline_mode = #tpu.pipeline_mode<synchronous>, transform_indices = @transform_6, window_bounds = array<i64: 1, 64>}, {pipeline_mode = #tpu.pipeline_mode<synchronous>, transform_indices = @transform_7, window_bounds = array<i64: 64, 128>}, {pipeline_mode = #tpu.pipeline_mode<synchronous>, transform_indices = @transform_8, window_bounds = array<i64: 1, 128>}, {transform_indices = @transform_9, window_bounds = array<i64: 128, 128>}]} {
    %c0 = arith.constant 0 : index
    %c0_0 = arith.constant 0 : index
    %0 = vector.load %arg1[%c0, %c0_0] : memref<128x32xf32, #tpu.memory_space<vmem>>, vector<128x32xf32>
    %1 = arith.truncf %0 : vector<128x32xf32> to vector<128x32xbf16>
    %c0_1 = arith.constant 0 : index
    %c0_2 = arith.constant 0 : index
    %2 = vector.load %arg2[%c0_1, %c0_2] : memref<32x256xbf16, #tpu.memory_space<vmem>>, vector<32x256xbf16>
    %cst = arith.constant dense<0.000000e+00> : vector<128x256xf32>
    %3 = tpu.matmul %1, %2, %cst {dimension_numbers = #tpu.dot_dimension_numbers<[1], [0], [0], [1], [0, 0, 1, 1], [], []>} : vector<128x32xbf16>, vector<32x256xbf16>, vector<128x256xf32> -> vector<128x256xf32>
    %c0_3 = arith.constant 0 : index
    %c0_4 = arith.constant 0 : index
    %4 = vector.load %arg3[%c0_3, %c0_4] : memref<1x256xf32, #tpu.memory_space<vmem>>, vector<1x256xf32>
    %5 = vector.broadcast %4 : vector<1x256xf32> to vector<128x256xf32>
    %6 = arith.addf %3, %5 : vector<128x256xf32>
    %cst_5 = arith.constant 0.000000e+00 : f32
    %7 = vector.broadcast %cst_5 : f32 to vector<128x256xf32>
    %8 = arith.maximumf %6, %7 : vector<128x256xf32>
    %9 = arith.truncf %8 : vector<128x256xf32> to vector<128x256xbf16>
    %c0_6 = arith.constant 0 : index
    %c0_7 = arith.constant 0 : index
    %10 = vector.load %arg4[%c0_6, %c0_7] : memref<256x128xbf16, #tpu.memory_space<vmem>>, vector<256x128xbf16>
    %cst_8 = arith.constant dense<0.000000e+00> : vector<128x128xf32>
    %11 = tpu.matmul %9, %10, %cst_8 {dimension_numbers = #tpu.dot_dimension_numbers<[1], [0], [0], [1], [0, 0, 1, 1], [], []>} : vector<128x256xbf16>, vector<256x128xbf16>, vector<128x128xf32> -> vector<128x128xf32>
    %c0_9 = arith.constant 0 : index
    %c0_10 = arith.constant 0 : index
    %12 = vector.load %arg5[%c0_9, %c0_10] : memref<1x128xf32, #tpu.memory_space<vmem>>, vector<1x128xf32>
    %13 = vector.broadcast %12 : vector<1x128xf32> to vector<128x128xf32>
    %14 = arith.addf %11, %13 : vector<128x128xf32>
    %cst_11 = arith.constant 0.000000e+00 : f32
    %15 = vector.broadcast %cst_11 : f32 to vector<128x128xf32>
    %16 = arith.maximumf %14, %15 : vector<128x128xf32>
    %17 = arith.truncf %16 : vector<128x128xf32> to vector<128x128xbf16>
    %c0_12 = arith.constant 0 : index
    %c0_13 = arith.constant 0 : index
    %18 = vector.load %arg6[%c0_12, %c0_13] : memref<128x64xbf16, #tpu.memory_space<vmem>>, vector<128x64xbf16>
    %cst_14 = arith.constant dense<0.000000e+00> : vector<128x64xf32>
    %19 = tpu.matmul %17, %18, %cst_14 {dimension_numbers = #tpu.dot_dimension_numbers<[1], [0], [0], [1], [0, 0, 1, 1], [], []>} : vector<128x128xbf16>, vector<128x64xbf16>, vector<128x64xf32> -> vector<128x64xf32>
    %c0_15 = arith.constant 0 : index
    %c0_16 = arith.constant 0 : index
    %20 = vector.load %arg7[%c0_15, %c0_16] : memref<1x64xf32, #tpu.memory_space<vmem>>, vector<1x64xf32>
    %21 = vector.broadcast %20 : vector<1x64xf32> to vector<128x64xf32>
    %22 = arith.addf %19, %21 : vector<128x64xf32>
    %cst_17 = arith.constant 0.000000e+00 : f32
    %23 = vector.broadcast %cst_17 : f32 to vector<128x64xf32>
    %24 = arith.maximumf %22, %23 : vector<128x64xf32>
    %25 = arith.truncf %24 : vector<128x64xf32> to vector<128x64xbf16>
    %c0_18 = arith.constant 0 : index
    %c0_19 = arith.constant 0 : index
    %26 = vector.load %arg8[%c0_18, %c0_19] : memref<64x128xbf16, #tpu.memory_space<vmem>>, vector<64x128xbf16>
    %cst_20 = arith.constant dense<0.000000e+00> : vector<128x128xf32>
    %27 = tpu.matmul %25, %26, %cst_20 {dimension_numbers = #tpu.dot_dimension_numbers<[1], [0], [0], [1], [0, 0, 1, 1], [], []>} : vector<128x64xbf16>, vector<64x128xbf16>, vector<128x128xf32> -> vector<128x128xf32>
    %c0_21 = arith.constant 0 : index
    %c0_22 = arith.constant 0 : index
    %28 = vector.load %arg9[%c0_21, %c0_22] : memref<1x128xf32, #tpu.memory_space<vmem>>, vector<1x128xf32>
    %29 = vector.broadcast %28 : vector<1x128xf32> to vector<128x128xf32>
    %30 = arith.addf %27, %29 : vector<128x128xf32>
    %31 = arith.truncf %30 : vector<128x128xf32> to vector<128x128xbf16>
    %c0_23 = arith.constant 0 : index
    %c0_24 = arith.constant 0 : index
    %32 = vector.load %arg10[%c0_23, %c0_24] : memref<128x128xbf16, #tpu.memory_space<vmem>>, vector<128x128xbf16>
    tpu.vector_store %arg10[%c0_23, %c0_24], %31 {strides = array<i32>} : memref<128x128xbf16, #tpu.memory_space<vmem>>, vector<128x128xbf16>,
    return
  }
  func.func @transform_0(%arg0: i32) -> (i32, i32) {
    %c0_i32 = arith.constant 0 : i32
    %c0_i32_0 = arith.constant 0 : i32
    return %arg0, %c0_i32 : i32, i32
  }
  func.func @transform_1(%arg0: i32) -> (i32, i32) {
    %c0_i32 = arith.constant 0 : i32
    %c0_i32_0 = arith.constant 0 : i32
    %c0_i32_1 = arith.constant 0 : i32
    return %c0_i32, %c0_i32_0 : i32, i32
  }
  func.func @transform_2(%arg0: i32) -> (i32, i32) {
    %c0_i32 = arith.constant 0 : i32
    %c0_i32_0 = arith.constant 0 : i32
    %c0_i32_1 = arith.constant 0 : i32
    return %c0_i32, %c0_i32_0 : i32, i32
  }
  func.func @transform_3(%arg0: i32) -> (i32, i32) {
    %c0_i32 = arith.constant 0 : i32
    %c0_i32_0 = arith.constant 0 : i32
    %c0_i32_1 = arith.constant 0 : i32
    return %c0_i32, %c0_i32_0 : i32, i32
  }
  func.func @transform_4(%arg0: i32) -> (i32, i32) {
    %c0_i32 = arith.constant 0 : i32
    %c0_i32_0 = arith.constant 0 : i32
    %c0_i32_1 = arith.constant 0 : i32
    return %c0_i32, %c0_i32_0 : i32, i32
  }
  func.func @transform_5(%arg0: i32) -> (i32, i32) {
    %c0_i32 = arith.constant 0 : i32
    %c0_i32_0 = arith.constant 0 : i32
    %c0_i32_1 = arith.constant 0 : i32
    return %c0_i32, %c0_i32_0 : i32, i32
  }
  func.func @transform_6(%arg0: i32) -> (i32, i32) {
    %c0_i32 = arith.constant 0 : i32
    %c0_i32_0 = arith.constant 0 : i32
    %c0_i32_1 = arith.constant 0 : i32
    return %c0_i32, %c0_i32_0 : i32, i32
  }
  func.func @transform_7(%arg0: i32) -> (i32, i32) {
    %c0_i32 = arith.constant 0 : i32
    %c0_i32_0 = arith.constant 0 : i32
    %c0_i32_1 = arith.constant 0 : i32
    return %c0_i32, %c0_i32_0 : i32, i32
  }
  func.func @transform_8(%arg0: i32) -> (i32, i32) {
    %c0_i32 = arith.constant 0 : i32
    %c0_i32_0 = arith.constant 0 : i32
    %c0_i32_1 = arith.constant 0 : i32
    return %c0_i32, %c0_i32_0 : i32, i32
  }
  func.func @transform_9(%arg0: i32) -> (i32, i32) {
    %c0_i32 = arith.constant 0 : i32
    %c0_i32_0 = arith.constant 0 : i32
    return %arg0, %c0_i32 : i32, i32
  }
}

</mosaic_0001>

<bundles_post_ra>
// kernel: actor_critic_forward.1
= control target key start
LH: loop header
LB: loop body
LE: loop exit
PB: predicated region body
PF: predicated region fallthrough
CT: control target
= control target key end

     0   :  { %s1727_s30 = smov 0   ;;  %s1962_s0 = inlined_call_operand.vmem [shape: f32[256,32], index: 0, kind: input, shape index: {}]   ;;  %s1963_s1 = inlined_call_operand.vmem [shape: bf16[32,256], index: 1, kind: input, shape index: {}]   ;;  %s1964_s2 = inlined_call_operand.vmem [shape: f32[1,256], index: 2, kind: input, shape index: {}]   ;;  %s1965_s3 = inlined_call_operand.vmem [shape: bf16[256,128], index: 3, kind: input, shape index: {}]   ;;  %s1966_s4 = inlined_call_operand.vmem [shape: f32[1,128], index: 4, kind: input, shape index: {}]   ;;  %s1967_s5 = inlined_call_operand.vmem [shape: bf16[128,64], index: 5, kind: input, shape index: {}]   ;;  %s1968_s6 = inlined_call_operand.vmem [shape: f32[1,64], index: 6, kind: input, shape index: {}]   ;;  %s1969_s7 = inlined_call_operand.vmem [shape: bf16[64,128], index: 7, kind: input, shape index: {}]   ;;  %s1970_s8 = inlined_call_operand.vmem [shape: f32[1,128], index: 8, kind: input, shape index: {}]   ;;  %s1971_s9 = inlined_call_operand.vmem [shape: bf16[256,128], index: 9, kind: output, shape index: {}]  }
   0x1 LB: > { %s1328_s10 = sadd.s32 4294967295, %s1674_s30   ;;  %p1332_p0 = scmp.ge.s32.totalorder %s1674_s30, 1  ;;  %s1674_s30 = sphi %s1727_s30, %s19_s30  }
   0x2   : > { %p288_p1 = scmp.lt.s32.totalorder %s1674_s30, 3 }
   0x4   : > { %p289_p2 = pnand %p1332_p0, %p288_p1 }
   0x5   : > { %v1634_v0 = vld [vmem:[%s1963_s1 + $0x4] ss:$8 sps:$4 sm:$0xff] (!%p289_p2)   ;;  %s1333_s13 = sshll.u32 (!%p289_p2), %s1328_s10, 4  ;;  %v1636_v1 = vld [vmem:[%s1963_s1] ss:$8 sps:$4 sm:$0xff] (!%p289_p2)   ;;  %v1676_v2 = vmov (!%p289_p2), 0   ;;  %v367_v48 = vlaneseq (!%p289_p2) }
   0x6   : > { %292 = sbr.rel (%p289_p2) target bundleno = 962 (0x3c2), region = 56  ;;  %454 = vmatprep.mubr.bf16.mxu0 (!%p289_p2), %v1676_v2  ;;  %p325_p3 = scmp.lt.s32.totalorder (!%p289_p2), %s1333_s13, 31  ;;  %422 = vmatprep.subr.bf16.mxu0 (!%p289_p2), %v1634_v0  ;;  %v1637_v3 = vld [vmem:[%s1963_s1 + $0x14] ss:$8 sps:$4 sm:$0xff] (!%p289_p2)   ;;  %v1639_v4 = vld [vmem:[%s1963_s1 + $0x10] ss:$8 sps:$4 sm:$0xff] (!%p289_p2)  }
   0x7   : > { %423 = vmatpush1.bf16.msra.mxu0 (!%p289_p2), %v1636_v1  ;;  %v1640_v5 = vld [vmem:[%s1965_s3 + $0x40] sm:$0xff] (!%p289_p2)   ;;  %v1642_v7 = vld [vmem:[%s1965_s3 + $0x48] sm:$0xff] (!%p289_p2)   ;;  %vm397_vm0 = vcmask (!%p289_p2), 261120   ;;  %v1644_v14 = vld [vmem:[%s1965_s3 + $0x50] sm:$0xff] (!%p289_p2)   ;;  %v368_v49 = vshrl.u32 (!%p289_p2), %v367_v48, 7  ;;  %vm1070_vm1 = vcmask (!%p289_p2), 523264  }
   0x8   : > { %424 = vmatprep.subr.bf16.mxu0 (!%p289_p2), %v1637_v3  ;;  %v1641_v6 = vld [vmem:[%s1965_s3] sm:$0xff] (!%p289_p2)   ;;  %1469 = vmatprep.subr.bf16.mxu1 (!%p289_p2), %v1640_v5  ;;  %v1643_v8 = vld [vmem:[%s1965_s3 + $0x8] sm:$0xff] (!%p289_p2)   ;;  %v1645_v15 = vld [vmem:[%s1965_s3 + $0x10] sm:$0xff] (!%p289_p2)  }
   0x9   : > { %1470 = vmatpush3.bf16.msra.mxu1 (!%p289_p2), %v1641_v6  ;;  %v1646_v17 = vld [vmem:[%s1965_s3 + $0x58] sm:$0xff] (!%p289_p2)   ;;  %v1648_v19 = vld [vmem:[%s1965_s3 + $0x60] sm:$0xff] (!%p289_p2)   ;;  %v1650_v23 = vld [vmem:[%s1965_s3 + $0x68] sm:$0xff] (!%p289_p2)   ;;  %v369_v50 = vsub.s32 (!%p289_p2), 0, %v368_v49  ;;  %v373_v52 = vsub.s32 (!%p289_p2), 1, %v368_v49 }
   0xa   : > { %1471 = vmatprep.subr.bf16.mxu1 (!%p289_p2), %v1642_v7  ;;  %v1647_v18 = vld [vmem:[%s1965_s3 + $0x18] sm:$0xff] (!%p289_p2)   ;;  %v1649_v22 = vld [vmem:[%s1965_s3 + $0x20] sm:$0xff] (!%p289_p2)   ;;  %v1651_v40 = vld [vmem:[%s1965_s3 + $0x28] sm:$0xff] (!%p289_p2)  }
   0xb   : > { %425 = vmatpush1.bf16.msra.mxu0 (!%p289_p2), %v1639_v4  ;;  %v1652_v41 = vld [vmem:[%s1965_s3 + $0x70] sm:$0xff] (!%p289_p2)   ;;  %v1654_v43 = vld [vmem:[%s1965_s3 + $0x78] sm:$0xff] (!%p289_p2)   ;;  %v1656_v45 = vld [vmem:[%s1967_s5] sm:$0xff] (!%p289_p2)  }
   0xc   : > { %v1653_v42 = vld [vmem:[%s1965_s3 + $0x30] sm:$0xff] (!%p289_p2)   ;;  %v1655_v44 = vld [vmem:[%s1965_s3 + $0x38] sm:$0xff] (!%p289_p2)   ;;  %v1657_v46 = vld [vmem:[%s1967_s5 + $0x8] sm:$0xff] (!%p289_p2)   ;;  %1561 = vmatprep.subr.bf16.mxu0 (!%p289_p2), %v1656_v45 }
   0xd   : > { %s1973_s13 = smov (!%p325_p3, %s1333_s13), 31  ;;  %1472 = vmatpush3.bf16.msra.mxu1 %v1643_v8  ;;  %v1658_v47 = vld [vmem:[%s1967_s5 + $0x10] sm:$0xff]   ;;  %v365_v51 = vld [vmem:[%s1964_s2] sm:$0x3] }
   0xe   : > { %s1334_s24 = sshll.u32 %s1973_s13, 3  ;;  %1473 = vmatprep.subr.bf16.mxu1 %v1644_v14  ;;  %v1847_v53 = vrot.slane %v365_v51, %v369_v50  ;;  %v1849_v54 = vrot.slane %v365_v51, %v373_v52  ;;  %s1336_s12 = sshll.u32 %s1973_s13, 2 }
   0xf   : > { %s1763_s29 = scalar_lea.vmem %s1962_s0, %s1334_s24 }
  0x10   : > { %v337_v9 = vld [vmem:[%s1763_s29] sm:$0xff]  ;;  %v338_v10 = vld [vmem:[%s1763_s29 + $0x8] sm:$0xff]  ;;  %v339_v12 = vld [vmem:[%s1763_s29 + $0x10] sm:$0xff] }
  0x11   : > { %v353_v11 = vpack.c.bf16 %v338_v10, %v337_v9  ;;  %v340_v13 = vld [vmem:[%s1763_s29 + $0x18] sm:$0xff]  ;;  %1474 = vmatpush3.bf16.msra.mxu1 %v1645_v15  ;;  %v341_v20 = vld [vmem:[%s1763_s29 + $0x20] sm:$0xff]  ;;  %v342_v21 = vld [vmem:[%s1763_s29 + $0x28] sm:$0xff] }
  0x12   : > { %v354_v16 = vpack.c.bf16 %v340_v13, %v339_v12  ;;  %1475 = vmatprep.subr.bf16.mxu1 %v1646_v17  ;;  %v355_v24 = vpack.c.bf16 %v342_v21, %v341_v20  ;;  %v343_v25 = vld [vmem:[%s1763_s29 + $0x30] sm:$0xff]  ;;  %v344_v26 = vld [vmem:[%s1763_s29 + $0x38] sm:$0xff]  ;;  %v345_v28 = vld [vmem:[%s1763_s29 + $0x40] sm:$0xff] }
  0x13   : > { %1341 = vmatmul.mubr.msk.bf16.vlgmr.msra.gmra.mrb[0].mxu0 %vm397_vm0, %v353_v11  ;;  %v356_v27 = vpack.c.bf16 %v344_v26, %v343_v25  ;;  %v346_v29 = vld [vmem:[%s1763_s29 + $0x48] sm:$0xff]  ;;  %v347_v31 = vld [vmem:[%s1763_s29 + $0x50] sm:$0xff]  ;;  %v348_v32 = vld [vmem:[%s1763_s29 + $0x58] sm:$0xff] }
  0x14   : > { %464 = vmatprep.mubr.bf16.mxu0 %v1676_v2  ;;  %v357_v30 = vpack.c.bf16 %v346_v29, %v345_v28  ;;  %v358_v33 = vpack.c.bf16 %v348_v32, %v347_v31  ;;  %v349_v34 = vld [vmem:[%s1763_s29 + $0x60] sm:$0xff]  ;;  %v350_v35 = vld [vmem:[%s1763_s29 + $0x68] sm:$0xff]  ;;  %v351_v37 = vld [vmem:[%s1763_s29 + $0x70] sm:$0xff]  ;;  %1562 = vmatpush3.bf16.msra.mxu0 %v1656_v45 }
  0x15   : > { %1476 = vmatpush3.bf16.msra.mxu1 %v1647_v18  ;;  %v359_v36 = vpack.c.bf16 %v350_v35, %v349_v34  ;;  %v352_v38 = vld [vmem:[%s1763_s29 + $0x78] sm:$0xff]  ;;  %1563 = vmatprep.subr.bf16.mxu0 %v1657_v46  ;;  %s1949_s29 = scalar_lea.vmem %s1971_s9, %s1336_s12 }
  0x16   : > { %1477 = vmatprep.subr.bf16.mxu1 %v1648_v19  ;;  %v360_v39 = vpack.c.bf16 %v352_v38, %v351_v37 }
  0x18   : > { %1564 = vmatpush3.bf16.msra.mxu0 %v1657_v46 }
  0x19   : > { %1478 = vmatpush3.bf16.msra.mxu1 %v1649_v22  ;;  %1565 = vmatprep.subr.bf16.mxu0 %v1658_v47 }
  0x1a   : > { %1479 = vmatprep.subr.bf16.mxu1 %v1650_v23 }
  0x1b   : > { %1342 = vmatmul.mubr.msk.bf16.gmra.mrb[4].mxu0 %vm397_vm0, %v354_v16 }
  0x1c   : > { %474 = vmatprep.mubr.bf16.mxu0 %v1676_v2  ;;  %1566 = vmatpush3.bf16.msra.mxu0 %v1658_v47 }
  0x1d   : > { %1480 = vmatpush3.bf16.msra.mxu1 %v1651_v40 }
  0x1e   : > { %1481 = vmatprep.subr.bf16.mxu1 %v1652_v41 }
  0x21   : > { %1482 = vmatpush3.bf16.msra.mxu1 %v1653_v42 }
  0x22   : > { %1483 = vmatprep.subr.bf16.mxu1 %v1654_v43 }
  0x23   : > { %1343 = vmatmul.mubr.msk.bf16.gmra.mrb[8].mxu0 %vm397_vm0, %v355_v24 }
  0x24   : > { %484 = vmatprep.mubr.bf16.mxu0 %v1676_v2 }
  0x25   : > { %1484 = vmatpush3.bf16.msra.mxu1 %v1655_v44 }
  0x2b   : > { %1344 = vmatmul.mubr.msk.bf16.gmra.mrb[12].mxu0 %vm397_vm0, %v356_v27 }
  0x2c   : > { %494 = vmatprep.mubr.bf16.mxu0 %v1676_v2 }
  0x33   : > { %1345 = vmatmul.mubr.msk.bf16.gmra.mrb[16].mxu0 %vm397_vm0, %v357_v30 }
  0x34   : > { %504 = vmatprep.mubr.bf16.mxu0 %v1676_v2 }
  0x3b   : > { %1346 = vmatmul.mubr.msk.bf16.gmra.mrb[20].mxu0 %vm397_vm0, %v358_v33 }
  0x3c   : > { %514 = vmatprep.mubr.bf16.mxu0 %v1676_v2 }
  0x43   : > { %1347 = vmatmul.mubr.msk.bf16.gmra.mrb[24].mxu0 %vm397_vm0, %v359_v36 }
  0x44   : > { %524 = vmatprep.mubr.bf16.mxu0 %v1676_v2 }
  0x4b   : > { %1348 = vmatmul.mubr.msk.bf16.gmra.mrb[28].mxu0 %vm397_vm0, %v360_v39 }
  0xe6   : > { %v456_v55 = vpop.f32.mrb[0].mxu0 }
  0xe7   : > { %v457_v56 = vadd.f32 %v456_v55, %v1847_v53  ;;  %v458_v57 = vpop.f32.mrb[1].mxu0 }
  0xe8   : > { %v459_v58 = vadd.f32 %v458_v57, %v1849_v54  ;;  %v460_v59 = vpop.f32.mrb[2].mxu0 }
  0xe9   : > { %v461_v60 = vadd.f32 %v460_v59, %v1847_v53  ;;  %v462_v61 = vpop.f32.mrb[3].mxu0  ;;  %v535_v63 = vmax.f32 %v457_v56, 0.0 }
  0xea   : > { %v463_v62 = vadd.f32 %v462_v61, %v1849_v54  ;;  %v536_v1 = vmax.f32 %v459_v58, 0.0 }
  0xeb   : > { %v537_v0 = vmax.f32 %v461_v60, 0.0 }
  0xec   : > { %v538_v2 = vmax.f32 %v463_v62, 0.0 }
  0xed   : > { %v567_v3 = vpack.c.bf16 %v537_v0, %v535_v63 }
  0xee   : > { %v466_v4 = vpop.f32.mrb[4].mxu0  ;;  %v568_v5 = vpack.c.bf16 %v538_v2, %v536_v1 }
  0xef   : > { %v467_v6 = vadd.f32 %v466_v4, %v1847_v53  ;;  %v468_v7 = vpop.f32.mrb[5].mxu0 }
  0xf0   : > { %v469_v8 = vadd.f32 %v468_v7, %v1849_v54  ;;  %v470_v9 = vpop.f32.mrb[6].mxu0  ;;  %750 = vmatprep.mubr.bf16.mxu1 %v568_v5 }
  0xf1   : > { %v471_v10 = vadd.f32 %v470_v9, %v1847_v53  ;;  %v472_v11 = vpop.f32.mrb[7].mxu0  ;;  %751 = vmatmul.mubr.bf16.vlgmr.msra.gmra.mrb[0].mxu1 %v567_v3  ;;  %v539_v13 = vmax.f32 %v467_v6, 0.0 }
  0xf2   : > { %v473_v12 = vadd.f32 %v472_v11, %v1849_v54  ;;  %v540_v15 = vmax.f32 %v469_v8, 0.0 }
  0xf3   : > { %v541_v14 = vmax.f32 %v471_v10, 0.0 }
  0xf4   : > { %v542_v16 = vmax.f32 %v473_v12, 0.0 }
  0xf5   : > { %v569_v17 = vpack.c.bf16 %v541_v14, %v539_v13 }
  0xf6   : > { %v570_v18 = vpack.c.bf16 %v542_v16, %v540_v15  ;;  %v476_v19 = vpop.f32.mrb[8].mxu0 }
  0xf7   : > { %v477_v20 = vadd.f32 %v476_v19, %v1847_v53  ;;  %v478_v21 = vpop.f32.mrb[9].mxu0 }
  0xf8   : > { %v479_v22 = vadd.f32 %v478_v21, %v1849_v54  ;;  %v480_v23 = vpop.f32.mrb[10].mxu0  ;;  %758 = vmatprep.mubr.bf16.mxu1 %v570_v18 }
  0xf9   : > { %v481_v24 = vadd.f32 %v480_v23, %v1847_v53  ;;  %v482_v25 = vpop.f32.mrb[11].mxu0  ;;  %759 = vmatmul.mubr.bf16.gmra.mrb[4].mxu1 %v569_v17  ;;  %v543_v27 = vmax.f32 %v477_v20, 0.0 }
  0xfa   : > { %v483_v26 = vadd.f32 %v482_v25, %v1849_v54  ;;  %v544_v29 = vmax.f32 %v479_v22, 0.0 }
  0xfb   : > { %v545_v28 = vmax.f32 %v481_v24, 0.0 }
  0xfc   : > { %v546_v30 = vmax.f32 %v483_v26, 0.0 }
  0xfd   : > { %v571_v31 = vpack.c.bf16 %v545_v28, %v543_v27 }
  0xfe   : > { %v572_v32 = vpack.c.bf16 %v546_v30, %v544_v29  ;;  %v486_v33 = vpop.f32.mrb[12].mxu0 }
  0xff   : > { %v487_v34 = vadd.f32 %v486_v33, %v1847_v53  ;;  %v488_v35 = vpop.f32.mrb[13].mxu0 }
 0x100   : > { %v489_v36 = vadd.f32 %v488_v35, %v1849_v54  ;;  %v490_v37 = vpop.f32.mrb[14].mxu0  ;;  %766 = vmatprep.mubr.bf16.mxu1 %v572_v32 }
 0x101   : > { %v491_v38 = vadd.f32 %v490_v37, %v1847_v53  ;;  %v492_v39 = vpop.f32.mrb[15].mxu0  ;;  %767 = vmatmul.mubr.bf16.gmra.mrb[8].mxu1 %v571_v31  ;;  %v547_v41 = vmax.f32 %v487_v34, 0.0 }
 0x102   : > { %v493_v40 = vadd.f32 %v492_v39, %v1849_v54  ;;  %v548_v43 = vmax.f32 %v489_v36, 0.0 }
 0x103   : > { %v549_v42 = vmax.f32 %v491_v38, 0.0 }
 0x104   : > { %v550_v44 = vmax.f32 %v493_v40, 0.0 }
 0x105   : > { %v573_v45 = vpack.c.bf16 %v549_v42, %v547_v41  ;;  %v1659_v41 = vld [vmem:[%s1967_s5 + $0x18] sm:$0xff]   ;;  %v1662_v42 = vld [vmem:[%s1967_s5 + $0x30] sm:$0xff]  }
 0x106   : > { %v574_v46 = vpack.c.bf16 %v550_v44, %v548_v43  ;;  %v496_v47 = vpop.f32.mrb[16].mxu0  ;;  %1567 = vmatprep.subr.bf16.mxu0 %v1659_v41  ;;  %v1663_v43 = vld [vmem:[%s1967_s5 + $0x38] sm:$0xff]   ;;  %v1664_v44 = vld [vmem:[%s1969_s7] sm:$0xff]  }
 0x107   : > { %v497_v48 = vadd.f32 %v496_v47, %v1847_v53  ;;  %v498_v49 = vpop.f32.mrb[17].mxu0  ;;  %1568 = vmatpush3.bf16.msra.mxu0 %v1659_v41  ;;  %1617 = vmatprep.subr.bf16.mxu1 %v1664_v44  ;;  %v1907_v47 = vld [vmem:[%s1966_s4] ss:$0 sm:$0xff] }
 0x108   : > { %v499_v50 = vadd.f32 %v498_v49, %v1849_v54  ;;  %v500_v51 = vpop.f32.mrb[18].mxu0  ;;  %774 = vmatprep.mubr.bf16.mxu1 %v574_v46  ;;  %1621 = vmatpush3.bf16.msra.mxu1 %v1664_v44 }
 0x109   : > { %v501_v52 = vadd.f32 %v500_v51, %v1847_v53  ;;  %v502_v55 = vpop.f32.mrb[19].mxu0  ;;  %775 = vmatmul.mubr.bf16.gmra.mrb[12].mxu1 %v573_v45  ;;  %v551_v57 = vmax.f32 %v497_v48, 0.0  ;;  %v1665_v45 = vld [vmem:[%s1969_s7 + $0x8] sm:$0xff]  }
 0x10a   : > { %v503_v56 = vadd.f32 %v502_v55, %v1849_v54  ;;  %v552_v59 = vmax.f32 %v499_v50, 0.0  ;;  %1618 = vmatprep.subr.bf16.mxu1 %v1665_v45 }
 0x10b   : > { %v553_v58 = vmax.f32 %v501_v52, 0.0 }
 0x10c   : > { %v554_v60 = vmax.f32 %v503_v56, 0.0  ;;  %1622 = vmatpush3.bf16.msra.mxu1 %v1665_v45 }
 0x10d   : > { %v575_v61 = vpack.c.bf16 %v553_v58, %v551_v57 }
 0x10e   : > { %v576_v62 = vpack.c.bf16 %v554_v60, %v552_v59  ;;  %v506_v63 = vpop.f32.mrb[20].mxu0 }
 0x10f   : > { %v507_v0 = vadd.f32 %v506_v63, %v1847_v53  ;;  %v508_v1 = vpop.f32.mrb[21].mxu0 }
 0x110   : > { %v509_v2 = vadd.f32 %v508_v1, %v1849_v54  ;;  %v510_v3 = vpop.f32.mrb[22].mxu0  ;;  %782 = vmatprep.mubr.bf16.mxu1 %v576_v62 }
 0x111   : > { %v511_v4 = vadd.f32 %v510_v3, %v1847_v53  ;;  %v512_v5 = vpop.f32.mrb[23].mxu0  ;;  %783 = vmatmul.mubr.bf16.gmra.mrb[16].mxu1 %v575_v61  ;;  %v555_v7 = vmax.f32 %v507_v0, 0.0 }
 0x112   : > { %v513_v6 = vadd.f32 %v512_v5, %v1849_v54  ;;  %v556_v9 = vmax.f32 %v509_v2, 0.0 }
 0x113   : > { %v557_v8 = vmax.f32 %v511_v4, 0.0 }
 0x114   : > { %v558_v10 = vmax.f32 %v513_v6, 0.0 }
 0x115   : > { %v577_v11 = vpack.c.bf16 %v557_v8, %v555_v7 }
 0x116   : > { %v578_v12 = vpack.c.bf16 %v558_v10, %v556_v9  ;;  %v516_v13 = vpop.f32.mrb[24].mxu0 }
 0x117   : > { %v517_v14 = vadd.f32 %v516_v13, %v1847_v53  ;;  %v518_v15 = vpop.f32.mrb[25].mxu0 }
 0x118   : > { %v519_v16 = vadd.f32 %v518_v15, %v1849_v54  ;;  %v520_v17 = vpop.f32.mrb[26].mxu0  ;;  %790 = vmatprep.mubr.bf16.mxu1 %v578_v12 }
 0x119   : > { %v521_v18 = vadd.f32 %v520_v17, %v1847_v53  ;;  %v522_v19 = vpop.f32.mrb[27].mxu0  ;;  %791 = vmatmul.mubr.bf16.gmra.mrb[20].mxu1 %v577_v11  ;;  %v559_v21 = vmax.f32 %v517_v14, 0.0 }
 0x11a   : > { %v523_v20 = vadd.f32 %v522_v19, %v1849_v54  ;;  %v560_v23 = vmax.f32 %v519_v16, 0.0 }
 0x11b   : > { %v561_v22 = vmax.f32 %v521_v18, 0.0 }
 0x11c   : > { %v562_v24 = vmax.f32 %v523_v20, 0.0 }
 0x11d   : > { %v579_v25 = vpack.c.bf16 %v561_v22, %v559_v21 }
 0x11e   : > { %v580_v26 = vpack.c.bf16 %v562_v24, %v560_v23  ;;  %v526_v27 = vpop.f32.mrb[28].mxu0 }
 0x11f   : > { %v527_v28 = vadd.f32 %v526_v27, %v1847_v53  ;;  %v528_v29 = vpop.f32.mrb[29].mxu0 }
 0x120   : > { %v529_v30 = vadd.f32 %v528_v29, %v1849_v54  ;;  %v530_v31 = vpop.f32.mrb[30].mxu0  ;;  %798 = vmatprep.mubr.bf16.mxu1 %v580_v26 }
 0x121   : > { %v531_v32 = vadd.f32 %v530_v31, %v1847_v53  ;;  %v532_v33 = vpop.f32.mrb[31].mxu0  ;;  %799 = vmatmul.mubr.bf16.gmra.mrb[24].mxu1 %v579_v25  ;;  %v563_v35 = vmax.f32 %v527_v28, 0.0  ;;  %v1660_v53 = vld [vmem:[%s1967_s5 + $0x20] sm:$0xff]  }
 0x122   : > { %v533_v34 = vadd.f32 %v532_v33, %v1849_v54  ;;  %v564_v37 = vmax.f32 %v529_v30, 0.0  ;;  %1569 = vmatprep.subr.bf16.mxu0 %v1660_v53  ;;  %v1661_v54 = vld [vmem:[%s1967_s5 + $0x28] sm:$0xff]  }
 0x123   : > { %v565_v36 = vmax.f32 %v531_v32, 0.0  ;;  %1570 = vmatpush3.bf16.msra.mxu0 %v1660_v53 }
 0x124   : > { %v566_v38 = vmax.f32 %v533_v34, 0.0  ;;  %1571 = vmatprep.subr.bf16.mxu0 %v1661_v54 }
 0x125   : > { %v581_v39 = vpack.c.bf16 %v565_v36, %v563_v35 }
 0x126   : > { %v582_v40 = vpack.c.bf16 %v566_v38, %v564_v37 }
 0x127   : > { %1572 = vmatpush3.bf16.msra.mxu0 %v1661_v54 }
 0x128   : > { %806 = vmatprep.mubr.bf16.mxu1 %v582_v40  ;;  %1573 = vmatprep.subr.bf16.mxu0 %v1662_v42 }
 0x129   : > { %807 = vmatmul.mubr.bf16.gmra.mrb[28].mxu1 %v581_v39 }
 0x12b   : > { %1574 = vmatpush3.bf16.msra.mxu0 %v1662_v42 }
 0x12c   : > { %1575 = vmatprep.subr.bf16.mxu0 %v1663_v43 }
 0x12f   : > { %1576 = vmatpush3.bf16.msra.mxu0 %v1663_v43 }
 0x130   : > { %1593 = vmatprep.subr.bf16.mxu0 %v1664_v44 }
 0x1c4   : > { %v1485_v46 = vpop.f32.mrb[0].mxu1 }
 0x1c5   : > { %v1486_v48 = vpop.f32.mrb[1].mxu1 }
 0x1c6   : > { %v1487_v49 = vadd.f32 %v1486_v48, %v1485_v46  ;;  %v1488_v50 = vpop.f32.mrb[2].mxu1 }
 0x1c7   : > { %v1489_v51 = vpop.f32.mrb[3].mxu1 }
 0x1c8   : > { %v753_v52 = vadd.f32 %v1487_v49, %v1907_v47  ;;  %v1490_v55 = vadd.f32 %v1489_v51, %v1488_v50 }
 0x1ca   : > { %v756_v56 = vadd.f32 %v1490_v55, %v1907_v47  ;;  %v815_v57 = vmax.f32 %v753_v52, 0.0 }
 0x1cc   : > { %v816_v58 = vmax.f32 %v756_v56, 0.0  ;;  %v1491_v59 = vpop.f32.mrb[4].mxu1 }
 0x1cd   : > { %v1492_v60 = vpop.f32.mrb[5].mxu1 }
 0x1ce   : > { %v1493_v61 = vadd.f32 %v1492_v60, %v1491_v59  ;;  %v1494_v62 = vpop.f32.mrb[6].mxu1  ;;  %v831_v63 = vpack.c.bf16 %v816_v58, %v815_v57 }
 0x1cf   : > { %v1495_v0 = vpop.f32.mrb[7].mxu1 }
 0x1d0   : > { %v761_v1 = vadd.f32 %v1493_v61, %v1907_v47  ;;  %v1496_v2 = vadd.f32 %v1495_v0, %v1494_v62  ;;  %1577 = vmatprep.mubr.bf16.mxu0 %v831_v63 }
 0x1d2   : > { %v764_v3 = vadd.f32 %v1496_v2, %v1907_v47  ;;  %v817_v4 = vmax.f32 %v761_v1, 0.0 }
 0x1d4   : > { %v818_v5 = vmax.f32 %v764_v3, 0.0  ;;  %v1497_v6 = vpop.f32.mrb[8].mxu1 }
 0x1d5   : > { %v1498_v7 = vpop.f32.mrb[9].mxu1 }
 0x1d6   : > { %v832_v8 = vpack.c.bf16 %v818_v5, %v817_v4  ;;  %v1499_v9 = vadd.f32 %v1498_v7, %v1497_v6  ;;  %v1500_v10 = vpop.f32.mrb[10].mxu1 }
 0x1d7   : > { %v1501_v11 = vpop.f32.mrb[11].mxu1 }
 0x1d8   : > { %v769_v12 = vadd.f32 %v1499_v9, %v1907_v47  ;;  %v1502_v13 = vadd.f32 %v1501_v11, %v1500_v10  ;;  %1578 = vmatmul.mubr.bf16.vlgmr.msra.gmra.mrb[32].mxu0 %v832_v8  ;;  %v1666_v10 = vld [vmem:[%s1969_s7 + $0x10] sm:$0xff]   ;;  %v1667_v11 = vld [vmem:[%s1969_s7 + $0x18] sm:$0xff]  }
 0x1d9   : > { %1594 = vmatpush3.bf16.msra.mxu0 %v1664_v44  ;;  %1619 = vmatprep.subr.bf16.mxu1 %v1666_v10 }
 0x1da   : > { %v772_v14 = vadd.f32 %v1502_v13, %v1907_v47  ;;  %1595 = vmatprep.subr.bf16.mxu0 %v1665_v45  ;;  %v819_v15 = vmax.f32 %v769_v12, 0.0  ;;  %1623 = vmatpush3.bf16.msra.mxu1 %v1666_v10 }
 0x1db   : > { %1620 = vmatprep.subr.bf16.mxu1 %v1667_v11 }
 0x1dc   : > { %v820_v16 = vmax.f32 %v772_v14, 0.0  ;;  %v1503_v17 = vpop.f32.mrb[12].mxu1 }
 0x1dd   : > { %v1504_v18 = vpop.f32.mrb[13].mxu1  ;;  %1596 = vmatpush3.bf16.msra.mxu0 %v1665_v45 }
 0x1de   : > { %v1505_v19 = vadd.f32 %v1504_v18, %v1503_v17  ;;  %v1506_v20 = vpop.f32.mrb[14].mxu1  ;;  %v833_v21 = vpack.c.bf16 %v820_v16, %v819_v15  ;;  %1597 = vmatprep.subr.bf16.mxu0 %v1666_v10  ;;  %1624 = vmatpush3.bf16.msra.mxu1 %v1667_v11 }
 0x1df   : > { %v1507_v22 = vpop.f32.mrb[15].mxu1 }
 0x1e0   : > { %v777_v23 = vadd.f32 %v1505_v19, %v1907_v47  ;;  %v1508_v24 = vadd.f32 %v1507_v22, %v1506_v20  ;;  %1581 = vmatprep.mubr.bf16.mxu0 %v833_v21 }
 0x1e1   : > { %1598 = vmatpush3.bf16.msra.mxu0 %v1666_v10 }
 0x1e2   : > { %v780_v25 = vadd.f32 %v1508_v24, %v1907_v47  ;;  %v821_v26 = vmax.f32 %v777_v23, 0.0  ;;  %1599 = vmatprep.subr.bf16.mxu0 %v1667_v11 }
 0x1e4   : > { %v822_v27 = vmax.f32 %v780_v25, 0.0  ;;  %v1509_v28 = vpop.f32.mrb[16].mxu1 }
 0x1e5   : > { %v1510_v29 = vpop.f32.mrb[17].mxu1  ;;  %1600 = vmatpush3.bf16.msra.mxu0 %v1667_v11 }
 0x1e6   : > { %v1511_v30 = vadd.f32 %v1510_v29, %v1509_v28  ;;  %v1512_v31 = vpop.f32.mrb[18].mxu1  ;;  %v834_v32 = vpack.c.bf16 %v822_v27, %v821_v26 }
 0x1e7   : > { %v1513_v33 = vpop.f32.mrb[19].mxu1 }
 0x1e8   : > { %v785_v34 = vadd.f32 %v1511_v30, %v1907_v47  ;;  %v1514_v35 = vadd.f32 %v1513_v33, %v1512_v31  ;;  %1582 = vmatmul.mubr.bf16.gmra.mrb[36].mxu0 %v834_v32 }
 0x1ea   : > { %v788_v36 = vadd.f32 %v1514_v35, %v1907_v47  ;;  %v823_v37 = vmax.f32 %v785_v34, 0.0 }
 0x1ec   : > { %v824_v38 = vmax.f32 %v788_v36, 0.0  ;;  %v1515_v39 = vpop.f32.mrb[20].mxu1 }
 0x1ed   : > { %v1516_v40 = vpop.f32.mrb[21].mxu1 }
 0x1ee   : > { %v1517_v41 = vadd.f32 %v1516_v40, %v1515_v39  ;;  %v1518_v53 = vpop.f32.mrb[22].mxu1  ;;  %v835_v54 = vpack.c.bf16 %v824_v38, %v823_v37 }
 0x1ef   : > { %v1519_v42 = vpop.f32.mrb[23].mxu1 }
 0x1f0   : > { %v793_v43 = vadd.f32 %v1517_v41, %v1907_v47  ;;  %v1520_v44 = vadd.f32 %v1519_v42, %v1518_v53  ;;  %1585 = vmatprep.mubr.bf16.mxu0 %v835_v54 }
 0x1f2   : > { %v796_v45 = vadd.f32 %v1520_v44, %v1907_v47  ;;  %v825_v46 = vmax.f32 %v793_v43, 0.0 }
 0x1f4   : > { %v826_v48 = vmax.f32 %v796_v45, 0.0  ;;  %v1521_v49 = vpop.f32.mrb[24].mxu1 }
 0x1f5   : > { %v1522_v50 = vpop.f32.mrb[25].mxu1 }
 0x1f6   : > { %v1523_v51 = vadd.f32 %v1522_v50, %v1521_v49  ;;  %v1524_v52 = vpop.f32.mrb[26].mxu1  ;;  %v836_v55 = vpack.c.bf16 %v826_v48, %v825_v46 }
 0x1f7   : > { %v1525_v56 = vpop.f32.mrb[27].mxu1 }
 0x1f8   : > { %v801_v57 = vadd.f32 %v1523_v51, %v1907_v47  ;;  %v1526_v58 = vadd.f32 %v1525_v56, %v1524_v52  ;;  %1586 = vmatmul.mubr.bf16.gmra.mrb[40].mxu0 %v836_v55 }
 0x1fa   : > { %v804_v59 = vadd.f32 %v1526_v58, %v1907_v47  ;;  %v827_v60 = vmax.f32 %v801_v57, 0.0 }
 0x1fc   : > { %v828_v61 = vmax.f32 %v804_v59, 0.0  ;;  %v1527_v62 = vpop.f32.mrb[28].mxu1 }
 0x1fd   : > { %v1528_v63 = vpop.f32.mrb[29].mxu1 }
 0x1fe   : > { %v1529_v0 = vadd.f32 %v1528_v63, %v1527_v62  ;;  %v1530_v1 = vpop.f32.mrb[30].mxu1  ;;  %v837_v2 = vpack.c.bf16 %v828_v61, %v827_v60 }
 0x1ff   : > { %v1531_v3 = vpop.f32.mrb[31].mxu1 }
 0x200   : > { %v809_v4 = vadd.f32 %v1529_v0, %v1907_v47  ;;  %v1532_v5 = vadd.f32 %v1531_v3, %v1530_v1  ;;  %1589 = vmatprep.mubr.bf16.mxu0 %v837_v2 }
 0x202   : > { %v812_v6 = vadd.f32 %v1532_v5, %v1907_v47  ;;  %v829_v7 = vmax.f32 %v809_v4, 0.0  ;;  %v1366_v47 = vld [vmem:[%s1968_s6] ss:$0 sm:$0xff] }
 0x204   : > { %v830_v8 = vmax.f32 %v812_v6, 0.0  ;;  %v1375_v6 = vld [vmem:[%s1970_s8] ss:$0 sm:$0xff] }
 0x206   : > { %v838_v9 = vpack.c.bf16 %v830_v8, %v829_v7 }
 0x208   : > { %1590 = vmatmul.mubr.bf16.gmra.mrb[44].mxu0 %v838_v9 }
 0x2ab   : > { %v1579_v12 = vpop.f32.mrb[32].mxu0 }
 0x2ac   : > { %v953_v13 = vadd.f32 %v1579_v12, %v1366_v47  ;;  %v944_v14 = vpop.f32.mrb[33].mxu0 }
 0x2ad   : > { %v945_v15 = vadd.f32 %v1366_v47, %v944_v14  ;;  %v1580_v16 = vpop.f32.mrb[34].mxu0 }
 0x2ae   : > { %v956_v17 = vadd.f32 %v1580_v16, %v1366_v47  ;;  %v947_v18 = vpop.f32.mrb[35].mxu0  ;;  %v1009_v20 = vmax.f32 %v953_v13, 0.0 }
 0x2af   : > { %v948_v19 = vadd.f32 %v1366_v47, %v947_v18  ;;  %v1007_v22 = vmax.f32 %v945_v15, 0.0 }
 0x2b0   : > { %v1010_v21 = vmax.f32 %v956_v17, 0.0 }
 0x2b1   : > { %v1008_v23 = vmax.f32 %v948_v19, 0.0 }
 0x2b2   : > { %v1024_v24 = vpack.c.bf16 %v1010_v21, %v1009_v20 }
 0x2b3   : > { %v1023_v25 = vpack.c.bf16 %v1008_v23, %v1007_v22 }
 0x2b5   : > { %1601 = vmatprep.mubr.msk.bf16.mxu0 %vm1070_vm1, %v1023_v25 }
 0x2b6   : > { %1602 = vmatmul.mubr.msk.bf16.vlgmr.msra.gmra.mrb[48].mxu0 %vm1070_vm1, %v1024_v24 }
 0x2bb   : > { %v1583_v26 = vpop.f32.mrb[36].mxu0 }
 0x2bc   : > { %v969_v27 = vadd.f32 %v1583_v26, %v1366_v47  ;;  %v960_v28 = vpop.f32.mrb[37].mxu0 }
 0x2bd   : > { %v961_v29 = vadd.f32 %v1366_v47, %v960_v28  ;;  %v1584_v30 = vpop.f32.mrb[38].mxu0 }
 0x2be   : > { %v972_v31 = vadd.f32 %v1584_v30, %v1366_v47  ;;  %v963_v32 = vpop.f32.mrb[39].mxu0  ;;  %v1013_v34 = vmax.f32 %v969_v27, 0.0 }
 0x2bf   : > { %v964_v33 = vadd.f32 %v1366_v47, %v963_v32  ;;  %v1011_v36 = vmax.f32 %v961_v29, 0.0 }
 0x2c0   : > { %v1014_v35 = vmax.f32 %v972_v31, 0.0 }
 0x2c1   : > { %v1012_v37 = vmax.f32 %v964_v33, 0.0 }
 0x2c2   : > { %v1026_v38 = vpack.c.bf16 %v1014_v35, %v1013_v34 }
 0x2c3   : > { %v1025_v39 = vpack.c.bf16 %v1012_v37, %v1011_v36 }
 0x2c5   : > { %1605 = vmatprep.mubr.msk.bf16.mxu1 %vm1070_vm1, %v1025_v39 }
 0x2c6   : > { %1606 = vmatmul.mubr.msk.bf16.vlgmr.msra.gmra.mrb[32].mxu1 %vm1070_vm1, %v1026_v38 }
 0x2cb   : > { %v1587_v40 = vpop.f32.mrb[40].mxu0 }
 0x2cc   : > { %v985_v41 = vadd.f32 %v1587_v40, %v1366_v47  ;;  %v976_v53 = vpop.f32.mrb[41].mxu0 }
 0x2cd   : > { %v977_v54 = vadd.f32 %v1366_v47, %v976_v53  ;;  %v1588_v42 = vpop.f32.mrb[42].mxu0 }
 0x2ce   : > { %v988_v43 = vadd.f32 %v1588_v42, %v1366_v47  ;;  %v979_v44 = vpop.f32.mrb[43].mxu0  ;;  %v1017_v46 = vmax.f32 %v985_v41, 0.0 }
 0x2cf   : > { %v980_v45 = vadd.f32 %v1366_v47, %v979_v44  ;;  %v1015_v49 = vmax.f32 %v977_v54, 0.0 }
 0x2d0   : > { %v1018_v48 = vmax.f32 %v988_v43, 0.0 }
 0x2d1   : > { %v1016_v50 = vmax.f32 %v980_v45, 0.0 }
 0x2d2   : > { %v1028_v51 = vpack.c.bf16 %v1018_v48, %v1017_v46 }
 0x2d3   : > { %v1027_v52 = vpack.c.bf16 %v1016_v50, %v1015_v49 }
 0x2d5   : > { %1609 = vmatprep.mubr.msk.bf16.mxu1 %vm1070_vm1, %v1027_v52 }
 0x2d6   : > { %1610 = vmatmul.mubr.msk.bf16.gmra.mrb[36].mxu1 %vm1070_vm1, %v1028_v51 }
 0x2db   : > { %v1591_v55 = vpop.f32.mrb[44].mxu0 }
 0x2dc   : > { %v1001_v56 = vadd.f32 %v1591_v55, %v1366_v47  ;;  %v992_v57 = vpop.f32.mrb[45].mxu0 }
 0x2dd   : > { %v993_v58 = vadd.f32 %v1366_v47, %v992_v57  ;;  %v1592_v59 = vpop.f32.mrb[46].mxu0 }
 0x2de   : > { %v1004_v60 = vadd.f32 %v1592_v59, %v1366_v47  ;;  %v995_v61 = vpop.f32.mrb[47].mxu0  ;;  %v1021_v63 = vmax.f32 %v1001_v56, 0.0 }
 0x2df   : > { %v996_v62 = vadd.f32 %v1366_v47, %v995_v61  ;;  %v1019_v1 = vmax.f32 %v993_v58, 0.0 }
 0x2e0   : > { %v1022_v0 = vmax.f32 %v1004_v60, 0.0 }
 0x2e1   : > { %v1020_v2 = vmax.f32 %v996_v62, 0.0 }
 0x2e2   : > { %v1030_v3 = vpack.c.bf16 %v1022_v0, %v1021_v63 }
 0x2e3   : > { %v1029_v4 = vpack.c.bf16 %v1020_v2, %v1019_v1 }
 0x2e5   : > { %1613 = vmatprep.mubr.msk.bf16.mxu1 %vm1070_vm1, %v1029_v4 }
 0x2e6   : > { %1614 = vmatmul.mubr.msk.bf16.gmra.mrb[40].mxu1 %vm1070_vm1, %v1030_v3 }
 0x389   : > { %v1603_v5 = vpop.f32.mrb[48].mxu0 }
 0x38a   : > { %v1129_v7 = vpop.f32.mrb[49].mxu0  ;;  %v1138_v9 = vadd.f32 %v1603_v5, %v1375_v6 }
 0x38b   : > { %v1604_v8 = vpop.f32.mrb[50].mxu0  ;;  %v1130_v47 = vadd.f32 %v1375_v6, %v1129_v7 }
 0x38c   : > { %v1141_v10 = vadd.f32 %v1604_v8, %v1375_v6  ;;  %v1132_v11 = vpop.f32.mrb[51].mxu0 }
 0x38d   : > { %v1133_v12 = vadd.f32 %v1375_v6, %v1132_v11 }
 0x38e   : > { %v1430_v13 = vpack.c.bf16 %v1141_v10, %v1138_v9 }
 0x38f   : > { %v1425_v14 = vpack.c.bf16 %v1133_v12, %v1130_v47 }
 0x390   : > { %1462 = vst [vmem:[%s1949_s29 + $0x8] sm:$0xff] %v1430_v13  }
 0x391   : > { %1426 = vst [vmem:[%s1949_s29] sm:$0xff] %v1425_v14  }
 0x399   : > { %v1607_v15 = vpop.f32.mrb[32].mxu1 }
 0x39a   : > { %v1145_v16 = vpop.f32.mrb[33].mxu1  ;;  %v1154_v18 = vadd.f32 %v1607_v15, %v1375_v6 }
 0x39b   : > { %v1608_v17 = vpop.f32.mrb[34].mxu1  ;;  %v1146_v21 = vadd.f32 %v1375_v6, %v1145_v16 }
 0x39c   : > { %v1157_v19 = vadd.f32 %v1608_v17, %v1375_v6  ;;  %v1148_v20 = vpop.f32.mrb[35].mxu1 }
 0x39d   : > { %v1149_v22 = vadd.f32 %v1375_v6, %v1148_v20 }
 0x39e   : > { %v1440_v23 = vpack.c.bf16 %v1157_v19, %v1154_v18 }
 0x39f   : > { %v1435_v24 = vpack.c.bf16 %v1149_v22, %v1146_v21 }
 0x3a0   : > { %1464 = vst [vmem:[%s1949_s29 + $0x18] sm:$0xff] %v1440_v23  }
 0x3a1   : > { %1463 = vst [vmem:[%s1949_s29 + $0x10] sm:$0xff] %v1435_v24  }
 0x3a9   : > { %v1611_v25 = vpop.f32.mrb[36].mxu1 }
 0x3aa   : > { %v1161_v26 = vpop.f32.mrb[37].mxu1  ;;  %v1170_v28 = vadd.f32 %v1611_v25, %v1375_v6 }
 0x3ab   : > { %v1612_v27 = vpop.f32.mrb[38].mxu1  ;;  %v1162_v31 = vadd.f32 %v1375_v6, %v1161_v26 }
 0x3ac   : > { %v1173_v29 = vadd.f32 %v1612_v27, %v1375_v6  ;;  %v1164_v30 = vpop.f32.mrb[39].mxu1 }
 0x3ad   : > { %v1165_v32 = vadd.f32 %v1375_v6, %v1164_v30 }
 0x3ae   : > { %v1450_v33 = vpack.c.bf16 %v1173_v29, %v1170_v28 }
 0x3af   : > { %v1445_v34 = vpack.c.bf16 %v1165_v32, %v1162_v31 }
 0x3b0   : > { %1466 = vst [vmem:[%s1949_s29 + $0x28] sm:$0xff] %v1450_v33  }
 0x3b1   : > { %1465 = vst [vmem:[%s1949_s29 + $0x20] sm:$0xff] %v1445_v34  }
 0x3b9   : > { %v1615_v35 = vpop.f32.mrb[40].mxu1 }
 0x3ba   : > { %v1177_v36 = vpop.f32.mrb[41].mxu1  ;;  %v1186_v38 = vadd.f32 %v1615_v35, %v1375_v6 }
 0x3bb   : > { %v1616_v37 = vpop.f32.mrb[42].mxu1  ;;  %v1178_v41 = vadd.f32 %v1375_v6, %v1177_v36 }
 0x3bc   : > { %v1189_v39 = vadd.f32 %v1616_v37, %v1375_v6  ;;  %v1180_v40 = vpop.f32.mrb[43].mxu1 }
 0x3bd   : > { %v1181_v53 = vadd.f32 %v1375_v6, %v1180_v40 }
 0x3be   : > { %v1460_v54 = vpack.c.bf16 %v1189_v39, %v1186_v38 }
 0x3bf   : > { %v1455_v42 = vpack.c.bf16 %v1181_v53, %v1178_v41 }
 0x3c0   : > { %1468 = vst [vmem:[%s1949_s29 + $0x38] sm:$0xff] %v1460_v54  }
 0x3c1   : > { %1467 = vst [vmem:[%s1949_s29 + $0x30] sm:$0xff] %v1455_v42  }
 0x3c2 PF: > { %s19_s30 = sadd.s32 1, %s1674_s30  }
 0x3c3   : > { %p16_p4 = scmp.ge.s32.totalorder %s19_s30, 4  }
 0x3c5   :  { %18 = sbr.rel (!%p16_p4) target bundleno = 1 (0x1), region = 86 }

</bundles_post_ra>
